<compile_context>
chip_gen: v7x
topology: tpu7x:2x2x1
jax: 0.10.0
libtpu: 0.0.40
codegen_flags: <defaults>
</compile_context>

<pallas_src>
import jax
import jax.numpy as jnp
from jax.experimental import pallas as pl
from jax.experimental.pallas import tpu as pltpu


# ----------------------------- Pallas kernels ---------------------------------
def gcn_layer_kernel(ahat_ref, x_ref, w_ref, b_ref, out_ref, acc_ref):
    """One GCN layer:  out = relu( (Ahat @ X) @ W + b ).

    grid = (row_tiles, k_tiles); k (reduction over Ahat columns) is last and
    "arbitrary"; the row axis is "parallel".  acc_ref is a f32 [tm, F] scratch
    holding the running Ahat @ X block.
    """
    k = pl.program_id(1)

    @pl.when(k == 0)
    def _():
        acc_ref[...] = jnp.zeros_like(acc_ref)

    # bf16 x bf16 -> f32 accumulate on the MXU.
    acc_ref[...] += jnp.dot(ahat_ref[...], x_ref[...],
                            preferred_element_type=jnp.float32)

    @pl.when(k == pl.num_programs(1) - 1)
    def _():
        h = jnp.dot(acc_ref[...].astype(jnp.bfloat16), w_ref[...],
                    preferred_element_type=jnp.float32) + b_ref[...]
        out_ref[...] = jnp.maximum(h, 0.0).astype(out_ref.dtype)


def pool_kernel(pool_ref, h_ref, out_ref, acc_ref):
    """global_mean_pool as pooled = P @ H, tiled over the node (reduction) axis."""
    k = pl.program_id(0)

    @pl.when(k == 0)
    def _():
        acc_ref[...] = jnp.zeros_like(acc_ref)

    acc_ref[...] += jnp.dot(pool_ref[...], h_ref[...],
                            preferred_element_type=jnp.float32)

    @pl.when(k == pl.num_programs(0) - 1)
    def _():
        out_ref[...] = acc_ref[...]


# ------------------------------ pallas_call wrappers ---------------------------
_VMEM_LIMIT = 48 * 1024 * 1024  # safe scoped-VMEM budget on v5e/v6e/v7x


def _gcn_layer_call(ahat_p, x_p, w_p, b_p, *, tm, tk):
    n_pad = ahat_p.shape[0]
    f_in = x_p.shape[1]
    h_out = w_p.shape[1]
    grid = (n_pad // tm, n_pad // tk)
    flops = 2 * n_pad * n_pad * f_in + 2 * n_pad * f_in * h_out
    bytes_accessed = (ahat_p.size * 2 + x_p.size * 2 + w_p.size * 2
                      + b_p.size * 4 + n_pad * h_out * 2)
    return pl.pallas_call(
        gcn_layer_kernel,
        out_shape=jax.ShapeDtypeStruct((n_pad, h_out), jnp.bfloat16),
        grid_spec=pltpu.PrefetchScalarGridSpec(
            num_scalar_prefetch=0,
            grid=grid,
            in_specs=[
                pl.BlockSpec((tm, tk), lambda i, k: (i, k)),      # Ahat tile
                pl.BlockSpec((tk, f_in), lambda i, k: (k, 0)),    # X rows
                pl.BlockSpec((f_in, h_out), lambda i, k: (0, 0)),  # W (resident)
                pl.BlockSpec((1, h_out), lambda i, k: (0, 0)),     # bias
            ],
            out_specs=pl.BlockSpec((tm, h_out), lambda i, k: (i, 0)),
            scratch_shapes=[pltpu.VMEM((tm, f_in), jnp.float32)],
        ),
        compiler_params=pltpu.CompilerParams(
            dimension_semantics=("parallel", "arbitrary"),
            vmem_limit_bytes=_VMEM_LIMIT,
        ),
        cost_estimate=pl.CostEstimate(
            flops=flops, transcendentals=0, bytes_accessed=bytes_accessed),
    )(ahat_p, x_p, w_p, b_p)


def _pool_call(pool_p, h_p, *, tk):
    g_pad, n_pad = pool_p.shape
    h_dim = h_p.shape[1]
    grid = (n_pad // tk,)
    return pl.pallas_call(
        pool_kernel,
        out_shape=jax.ShapeDtypeStruct((g_pad, h_dim), jnp.float32),
        grid_spec=pltpu.PrefetchScalarGridSpec(
            num_scalar_prefetch=0,
            grid=grid,
            in_specs=[
                pl.BlockSpec((g_pad, tk), lambda k: (0, k)),
                pl.BlockSpec((tk, h_dim), lambda k: (k, 0)),
            ],
            out_specs=pl.BlockSpec((g_pad, h_dim), lambda k: (0, 0)),
            scratch_shapes=[pltpu.VMEM((g_pad, h_dim), jnp.float32)],
        ),
        compiler_params=pltpu.CompilerParams(
            dimension_semantics=("arbitrary",),
            vmem_limit_bytes=_VMEM_LIMIT,
        ),
        cost_estimate=pl.CostEstimate(
            flops=2 * g_pad * n_pad * h_dim, transcendentals=0,
            bytes_accessed=pool_p.size * 2 + h_p.size * 2 + g_pad * h_dim * 4),
    )(pool_p, h_p)


# ------------------------------ JAX glue --------------------------------------
def _round_up(x, m):
    return ((x + m - 1) // m) * m


def _pad2(a, rows, cols, dtype):
    out = jnp.zeros((rows, cols), dtype)
    return out.at[:a.shape[0], :a.shape[1]].set(a.astype(dtype))


def build_ahat(edge_index, num_nodes):
    """Dense D^-1/2 (A + I) D^-1/2 with Ahat[dst, src] entries (PyG gcn_norm)."""
    src = edge_index[0]
    dst = edge_index[1]
    loop = jnp.arange(num_nodes, dtype=edge_index.dtype)
    src = jnp.concatenate([src, loop])
    dst = jnp.concatenate([dst, loop])
    deg = jnp.zeros((num_nodes,), jnp.float32).at[dst].add(1.0)
    dinv = jnp.where(deg > 0, 1.0 / jnp.sqrt(deg), 0.0)
    norm = dinv[src] * dinv[dst]
    ahat = jnp.zeros((num_nodes, num_nodes), jnp.float32).at[dst, src].add(norm)
    return ahat


def build_pool(batch, num_graphs):
    """P[g, i] = 1/|graph g| if batch[i] == g else 0  (global mean pool)."""
    onehot = (batch[None, :] == jnp.arange(num_graphs)[:, None]).astype(jnp.float32)
    counts = jnp.maximum(onehot.sum(axis=1, keepdims=True), 1.0)
    return onehot / counts


def basic_gnn_forward(x, edge_index, batch, depth, params):
    n, fin = x.shape
    g = depth.shape[0]
    hidden = params["w1"].shape[1]

    # Lane/sublane-dense padded sizes.
    n_pad = _round_up(n, 128)
    f_pad = _round_up(fin, 128)
    h_pad = _round_up(hidden, 128)
    g_pad = _round_up(g, 16)

    # Tile sizes over the Ahat matmul (multiples of (8,128); grow with N).
    tm = 256 if n_pad % 256 == 0 else 128
    tk = next(t for t in (512, 256, 128) if n_pad % t == 0)

    ahat = build_ahat(edge_index, n)        # [N, N] f32
    pool = build_pool(batch, g)             # [G, N] f32

    # Zero-padded bf16 MXU operands; biases stay f32.
    ahat_p = _pad2(ahat, n_pad, n_pad, jnp.bfloat16)
    x_p = _pad2(x, n_pad, f_pad, jnp.bfloat16)
    pool_p = _pad2(pool, g_pad, n_pad, jnp.bfloat16)
    w1_p = _pad2(params["w1"], f_pad, h_pad, jnp.bfloat16)
    w2_p = _pad2(params["w2"], h_pad, h_pad, jnp.bfloat16)
    b1_p = _pad2(params["b1"], 1, h_pad, jnp.float32)
    b2_p = _pad2(params["b2"], 1, h_pad, jnp.float32)

    h1 = _gcn_layer_call(ahat_p, x_p, w1_p, b1_p, tm=tm, tk=tk)   # [N_pad, H_pad] bf16
    h2 = _gcn_layer_call(ahat_p, h1, w2_p, b2_p, tm=tm, tk=tk)    # [N_pad, H_pad] bf16
    pooled = _pool_call(pool_p, h2, tk=tk)                        # [G_pad, H_pad] f32

    # Tiny output Linear on concat([pooled, depth]) done in XLA (lane-dense
    # kernel outputs; avoids a (G,1) masked-store path inside the kernel).
    w_h = params["wout"][:hidden, :]                # [H, 1]
    w_d = params["wout"][hidden:hidden + 1, :]      # [1, 1]
    z = (pooled[:g, :hidden] @ w_h
         + depth.astype(jnp.float32)[:, None] * w_d
         + params["bout"])                          # [G, 1]
    return z[:, 0]                                  # .squeeze(-1)


# Pure-JAX f32 reference (same math, no Pallas, no bf16) for a sanity check.
def basic_gnn_reference(x, edge_index, batch, depth, params):
    ahat = build_ahat(edge_index, x.shape[0])
    pool = build_pool(batch, depth.shape[0])
    h = jnp.maximum(ahat @ (x @ params["w1"]) + params["b1"], 0.0)
    h = jnp.maximum(ahat @ (h @ params["w2"]) + params["b2"], 0.0)
    pooled = pool @ h
    z = jnp.concatenate([pooled, depth[:, None]], axis=-1)
    return (z @ params["wout"] + params["bout"])[:, 0]


# --------------------------------- main ----------------------------------------
if __name__ == "__main__":
    N, FIN, HIDDEN, G = 16, 4, 32, 2   # small demo shapes; hidden_dim=32

    key = jax.random.PRNGKey(0)
    k_x, k_w1, k_w2, k_wo, k_d = jax.random.split(key, 5)

    # Node features, graph assignment, per-graph depth.
    x = jax.random.normal(k_x, (N, FIN), jnp.float32)
    batch = jnp.concatenate([jnp.zeros(N // 2, jnp.int32),
                             jnp.ones(N - N // 2, jnp.int32)])
    depth = jax.random.uniform(k_d, (G,), jnp.float32)

    # Deterministic ring edges within each of the 2 graphs (made symmetric).
    src0 = jnp.arange(N // 2, dtype=jnp.int32)
    dst0 = (src0 + 1) % (N // 2)
    src1 = src0 + N // 2
    dst1 = dst0 + N // 2
    src = jnp.concatenate([src0, dst0, src1, dst1])
    dst = jnp.concatenate([dst0, src0, dst1, src1])
    edge_index = jnp.stack([src, dst], axis=0)   # [2, E]

    # Parameters (GCNConv: weight [Fin,H]/[H,H] + bias; Linear: [H+1,1] + bias).
    params = {
        "w1": jax.random.normal(k_w1, (FIN, HIDDEN), jnp.float32) * 0.2,
        "b1": jnp.zeros((1, HIDDEN), jnp.float32),
        "w2": jax.random.normal(k_w2, (HIDDEN, HIDDEN), jnp.float32) * 0.2,
        "b2": jnp.zeros((1, HIDDEN), jnp.float32),
        "wout": jax.random.normal(k_wo, (HIDDEN + 1, 1), jnp.float32) * 0.2,
        "bout": jnp.zeros((1, 1), jnp.float32),
    }

    out = basic_gnn_forward(x, edge_index, batch, depth, params)
    out = jax.block_until_ready(out)

    ref = basic_gnn_reference(x, edge_index, batch, depth, params)
    assert out.shape == (G,)
    # Kernel uses bf16 MXU operands (f32 accumulate); compare vs f32 reference
    # with a bf16-appropriate tolerance.
    assert jnp.allclose(out, ref, atol=5e-2, rtol=5e-2), (out, ref)

    print("KERNEL_OK")
</pallas_src>

<mosaic_0001>
module attributes {stable_mosaic.version = 11 : i64} {
  func.func @gcn_layer_kernel(%arg0: i32, %arg1: i32, %arg2: memref<128x128xbf16, #tpu.memory_space<vmem>>, %arg3: memref<128x128xbf16, #tpu.memory_space<vmem>>, %arg4: memref<128x128xbf16, #tpu.memory_space<vmem>>, %arg5: memref<1x128xf32, #tpu.memory_space<vmem>>, %arg6: memref<128x128xbf16, #tpu.memory_space<vmem>>, %arg7: memref<128x128xf32, #tpu.memory_space<vmem>>) attributes {dimension_semantics = [#tpu.dimension_semantics<parallel>, #tpu.dimension_semantics<arbitrary>], iteration_bounds = array<i64: 1, 1>, scalar_prefetch = 0 : i64, scratch_operands = 1 : i64, tpu.core_type = #tpu.core_type<tc>, window_params = [{transform_indices = @transform_0, window_bounds = array<i64: 128, 128>}, {transform_indices = @transform_1, window_bounds = array<i64: 128, 128>}, {pipeline_mode = #tpu.pipeline_mode<synchronous>, transform_indices = @transform_2, window_bounds = array<i64: 128, 128>}, {pipeline_mode = #tpu.pipeline_mode<synchronous>, transform_indices = @transform_3, window_bounds = array<i64: 1, 128>}, {transform_indices = @transform_4, window_bounds = array<i64: 128, 128>}]} {
    %c0_i32 = arith.constant 0 : i32
    %0 = arith.cmpi eq, %arg1, %c0_i32 : i32
    %1 = arith.extui %0 : i1 to i32
    %c0_i32_0 = arith.constant 0 : i32
    %2 = arith.cmpi ne, %1, %c0_i32_0 : i32
    scf.if %2 {
      %cst_10 = arith.constant 0.000000e+00 : f32
      %12 = vector.broadcast %cst_10 : f32 to vector<128x128xf32>
      %c0_11 = arith.constant 0 : index
      %c0_12 = arith.constant 0 : index
      %13 = vector.load %arg7[%c0_11, %c0_12] : memref<128x128xf32, #tpu.memory_space<vmem>>, vector<128x128xf32>
      tpu.vector_store %arg7[%c0_11, %c0_12], %12 {strides = array<i32>} : memref<128x128xf32, #tpu.memory_space<vmem>>, vector<128x128xf32>,
    } else {
    }
    %c0 = arith.constant 0 : index
    %c0_1 = arith.constant 0 : index
    %3 = vector.load %arg7[%c0, %c0_1] : memref<128x128xf32, #tpu.memory_space<vmem>>, vector<128x128xf32>
    %c0_2 = arith.constant 0 : index
    %c0_3 = arith.constant 0 : index
    %4 = vector.load %arg2[%c0_2, %c0_3] : memref<128x128xbf16, #tpu.memory_space<vmem>>, vector<128x128xbf16>
    %c0_4 = arith.constant 0 : index
    %c0_5 = arith.constant 0 : index
    %5 = vector.load %arg3[%c0_4, %c0_5] : memref<128x128xbf16, #tpu.memory_space<vmem>>, vector<128x128xbf16>
    %cst = arith.constant dense<0.000000e+00> : vector<128x128xf32>
    %6 = tpu.matmul %4, %5, %cst {dimension_numbers = #tpu.dot_dimension_numbers<[1], [0], [0], [1], [0, 0, 1, 1], [], []>} : vector<128x128xbf16>, vector<128x128xbf16>, vector<128x128xf32> -> vector<128x128xf32>
    %7 = arith.addf %3, %6 : vector<128x128xf32>
    %c0_6 = arith.constant 0 : index
    %c0_7 = arith.constant 0 : index
    %8 = vector.load %arg7[%c0_6, %c0_7] : memref<128x128xf32, #tpu.memory_space<vmem>>, vector<128x128xf32>
    tpu.vector_store %arg7[%c0_6, %c0_7], %7 {strides = array<i32>} : memref<128x128xf32, #tpu.memory_space<vmem>>, vector<128x128xf32>,
    %c0_i32_8 = arith.constant 0 : i32
    %9 = arith.cmpi eq, %arg1, %c0_i32_8 : i32
    %10 = arith.extui %9 : i1 to i32
    %c0_i32_9 = arith.constant 0 : i32
    %11 = arith.cmpi ne, %10, %c0_i32_9 : i32
    scf.if %11 {
      %c0_10 = arith.constant 0 : index
      %c0_11 = arith.constant 0 : index
      %12 = vector.load %arg7[%c0_10, %c0_11] : memref<128x128xf32, #tpu.memory_space<vmem>>, vector<128x128xf32>
      %13 = arith.truncf %12 : vector<128x128xf32> to vector<128x128xbf16>
      %c0_12 = arith.constant 0 : index
      %c0_13 = arith.constant 0 : index
      %14 = vector.load %arg4[%c0_12, %c0_13] : memref<128x128xbf16, #tpu.memory_space<vmem>>, vector<128x128xbf16>
      %cst_14 = arith.constant dense<0.000000e+00> : vector<128x128xf32>
      %15 = tpu.matmul %13, %14, %cst_14 {dimension_numbers = #tpu.dot_dimension_numbers<[1], [0], [0], [1], [0, 0, 1, 1], [], []>} : vector<128x128xbf16>, vector<128x128xbf16>, vector<128x128xf32> -> vector<128x128xf32>
      %c0_15 = arith.constant 0 : index
      %c0_16 = arith.constant 0 : index
      %16 = vector.load %arg5[%c0_15, %c0_16] : memref<1x128xf32, #tpu.memory_space<vmem>>, vector<1x128xf32>
      %17 = vector.broadcast %16 : vector<1x128xf32> to vector<128x128xf32>
      %18 = arith.addf %15, %17 : vector<128x128xf32>
      %cst_17 = arith.constant 0.000000e+00 : f32
      %19 = vector.broadcast %cst_17 : f32 to vector<128x128xf32>
      %20 = arith.maximumf %18, %19 : vector<128x128xf32>
      %21 = arith.truncf %20 : vector<128x128xf32> to vector<128x128xbf16>
      %c0_18 = arith.constant 0 : index
      %c0_19 = arith.constant 0 : index
      %22 = vector.load %arg6[%c0_18, %c0_19] : memref<128x128xbf16, #tpu.memory_space<vmem>>, vector<128x128xbf16>
      tpu.vector_store %arg6[%c0_18, %c0_19], %21 {strides = array<i32>} : memref<128x128xbf16, #tpu.memory_space<vmem>>, vector<128x128xbf16>,
    } else {
    }
    return
  }
  func.func @transform_0(%arg0: i32, %arg1: i32) -> (i32, i32) {
    %c0_i32 = arith.constant 0 : i32
    return %arg0, %arg1 : i32, i32
  }
  func.func @transform_1(%arg0: i32, %arg1: i32) -> (i32, i32) {
    %c0_i32 = arith.constant 0 : i32
    %c0_i32_0 = arith.constant 0 : i32
    return %arg1, %c0_i32 : i32, i32
  }
  func.func @transform_2(%arg0: i32, %arg1: i32) -> (i32, i32) {
    %c0_i32 = arith.constant 0 : i32
    %c0_i32_0 = arith.constant 0 : i32
    %c0_i32_1 = arith.constant 0 : i32
    return %c0_i32, %c0_i32_0 : i32, i32
  }
  func.func @transform_3(%arg0: i32, %arg1: i32) -> (i32, i32) {
    %c0_i32 = arith.constant 0 : i32
    %c0_i32_0 = arith.constant 0 : i32
    %c0_i32_1 = arith.constant 0 : i32
    return %c0_i32, %c0_i32_0 : i32, i32
  }
  func.func @transform_4(%arg0: i32, %arg1: i32) -> (i32, i32) {
    %c0_i32 = arith.constant 0 : i32
    %c0_i32_0 = arith.constant 0 : i32
    return %arg0, %c0_i32 : i32, i32
  }
}

</mosaic_0001>

<bundles_post_ra>
// kernel: tpu_custom_call.1
= control target key start
LH: loop header
LB: loop body
LE: loop exit
PB: predicated region body
PF: predicated region fallthrough
CT: control target
= control target key end

     0   :  { %9 = vsyncpa [#allocation4], 0  ;;  %s1087_s0 = inlined_call_operand.hbm [shape: bf16[128,128], index: 0, kind: input, shape index: {}]   ;;  %s1088_s1 = inlined_call_operand.hbm [shape: bf16[128,128], index: 1, kind: input, shape index: {}]   ;;  %s1089_s2 = inlined_call_operand.hbm [shape: bf16[128,128], index: 2, kind: input, shape index: {}]   ;;  %s1090_s3 = inlined_call_operand.vmem [shape: f32[1,128], index: 3, kind: input, shape index: {}]   ;;  %s1091_s4 = inlined_call_operand.hbm [shape: bf16[128,128], index: 4, kind: output, shape index: {}]  }
   0x1   :  { %10 = vsyncpa [#allocation7], 0 }
   0x2   :  { %11 = vsyncpa [#allocation5], 0  ;;  %s986_s15 = smov [#allocation6]   ;;  %s987_s17 = smov [#allocation3]  }
   0x3   :  { %s29_s16 = sshll.u32 %s986_s15, 4  ;;  %s17_s18 = sshll.u32 %s987_s17, 4  ;;  %s30_s16 = int_to_ptr.vmem [resolvable:$true] %s29_s16  ;;  %s1017_s18 = int_to_ptr.vmem [resolvable:$true] %s17_s18 }
   0x4   :  { %s892_s21 = scalar_lea.hbm %s1088_s1, 1024 }
   0x5   :  { %p893_p0 = scmp.ne.s32.totalorder %s1088_s1, %s892_s21  ;;  %p896_p1 = scmp.lt.u32.totalorder %s892_s21, %s1088_s1 }
   0x7   :  { %p898_p2 = pnand %p896_p1, %p893_p0 }
   0x9   :  { %901 = shalt.err (!%p898_p2)
}
   0xa   :  { %s902_s26 = scalar_lea.vmem %s30_s16, 1024  ;;  %p907_p4 = scmp.lt.s32.totalorder %s30_s16, %s30_s16 }
   0xb   :  { %p903_p3 = scmp.ne.s32.totalorder %s30_s16, %s902_s26  ;;  %p908_p5 = scmp.lt.s32.totalorder %s902_s26, %s902_s26 }
   0xd   :  { %p909_p6 = por %p908_p5, %p907_p4 }
   0xf   :  { %p910_p7 = pnand %p909_p6, %p903_p3 }
  0x11   :  { %913 = shalt.err (!%p910_p7)
}
  0x12   :  { %s988_s27 = smov 64   ;;  %s989_s28 = smov 4  }
  0x13   :  { %35 = dma.hbm_to_vmem [thread:$0]  %s1088_s1, 1024, %s30_s16, [#allocation7], %s988_s27, %s988_s27, %s989_s28  }
  0x14   :  { %s914_s7 = scalar_lea.hbm %s1087_s0, 1024 }
  0x15   :  { %p915_p8 = scmp.ne.s32.totalorder %s1087_s0, %s914_s7  ;;  %p918_p9 = scmp.lt.u32.totalorder %s914_s7, %s1087_s0 }
  0x17   :  { %p920_p10 = pnand %p918_p9, %p915_p8 }
  0x19   :  { %923 = shalt.err (!%p920_p10)
}
  0x1a   :  { %s924_s12 = scalar_lea.vmem %s1017_s18, 1024  ;;  %p929_p12 = scmp.lt.s32.totalorder %s1017_s18, %s1017_s18 }
  0x1b   :  { %p925_p11 = scmp.ne.s32.totalorder %s1017_s18, %s924_s12  ;;  %p930_p13 = scmp.lt.s32.totalorder %s924_s12, %s924_s12 }
  0x1d   :  { %p931_p0 = por %p930_p13, %p929_p12 }
  0x1f   :  { %p932_p1 = pnand %p931_p0, %p925_p11 }
  0x21   :  { %935 = shalt.err (!%p932_p1)
}
  0x22   :  { %23 = dma.hbm_to_vmem [thread:$0]  %s1087_s0, 1024, %s1017_s18, [#allocation4], %s988_s27, %s988_s27, %s989_s28  }
  0x23   :  { %s990_s14 = smov [#allocation8]   ;;  %s936_s19 = scalar_lea.hbm %s1089_s2, 1024 }
  0x24   :  { %s41_s15 = sshll.u32 %s990_s14, 4  ;;  %p937_p2 = scmp.ne.s32.totalorder %s1089_s2, %s936_s19  ;;  %s42_s15 = int_to_ptr.vmem [resolvable:$true] %s41_s15 }
  0x25   :  { %p940_p3 = scmp.lt.u32.totalorder %s936_s19, %s1089_s2 }
  0x27   :  { %p942_p4 = pnand %p940_p3, %p937_p2 }
  0x29   :  { %945 = shalt.err (!%p942_p4)
}
  0x2a   :  { %s946_s24 = scalar_lea.vmem %s42_s15, 1024  ;;  %p951_p6 = scmp.lt.s32.totalorder %s42_s15, %s42_s15 }
  0x2b   :  { %p947_p5 = scmp.ne.s32.totalorder %s42_s15, %s946_s24  ;;  %p952_p7 = scmp.lt.s32.totalorder %s946_s24, %s946_s24 }
  0x2d   :  { %p953_p8 = por %p952_p7, %p951_p6 }
  0x2f   :  { %p954_p9 = pnand %p953_p8, %p947_p5 }
  0x31   :  { %957 = shalt.err (!%p954_p9)
}
  0x32   :  { %47 = dma.hbm_to_vmem [thread:$0]  %s1089_s2, 1024, %s42_s15, [#allocation7], %s988_s27, %s988_s27, %s989_s28  }
  0x33   :  { %980 = dma.done.wait [#allocation4], 1024  }
  0x34   :  { %981 = vsyncadd [#allocation4], 4294966272 }
  0x35   :  { %982 = dma.done.wait [#allocation7], 2048  }
  0x36   :  { %983 = vsyncadd [#allocation7], 4294965248  ;;  %v868_v0 = vld [vmem:[#allocation6] sm:$0xff]   ;;  %v869_v1 = vld [vmem:[#allocation6 + $0x8] sm:$0xff]  }
  0x37   :  { %798 = vmatprep.subr.bf16.mxu0 %v868_v0  ;;  %v870_v2 = vld [vmem:[#allocation6 + $0x10] sm:$0xff]   ;;  %v871_v3 = vld [vmem:[#allocation6 + $0x18] sm:$0xff]   ;;  %v876_v4 = vld [vmem:[#allocation3] sm:$0xff]  }
  0x38   :  { %799 = vmatpush3.bf16.msra.mxu0 %v868_v0  ;;  %814 = vmatprep.mubr.bf16.mxu0 %v876_v4  ;;  %v872_v5 = vld [vmem:[#allocation6 + $0x20] sm:$0xff]   ;;  %v873_v6 = vld [vmem:[#allocation6 + $0x28] sm:$0xff]   ;;  %v874_v9 = vld [vmem:[#allocation6 + $0x30] sm:$0xff]  }
  0x39   :  { %800 = vmatprep.subr.bf16.mxu0 %v869_v1  ;;  %v884_v7 = vld [vmem:[#allocation8] sm:$0xff]   ;;  %v885_v8 = vld [vmem:[#allocation8 + $0x8] sm:$0xff]   ;;  %v886_v10 = vld [vmem:[#allocation8 + $0x10] sm:$0xff]  }
  0x3a   :  { %830 = vmatprep.subr.bf16.mxu1 %v884_v7  ;;  %v875_v11 = vld [vmem:[#allocation6 + $0x38] sm:$0xff]   ;;  %v888_v13 = vld [vmem:[#allocation8 + $0x20] sm:$0xff]   ;;  %v877_v14 = vld [vmem:[#allocation3 + $0x8] sm:$0xff]  }
  0x3b   :  { %831 = vmatpush3.bf16.msra.mxu1 %v884_v7  ;;  %v887_v12 = vld [vmem:[#allocation8 + $0x18] sm:$0xff]   ;;  %v878_v15 = vld [vmem:[#allocation3 + $0x10] sm:$0xff]   ;;  %v889_v16 = vld [vmem:[#allocation8 + $0x28] sm:$0xff]  }
  0x3c   :  { %801 = vmatpush3.bf16.msra.mxu0 %v869_v1  ;;  %832 = vmatprep.subr.bf16.mxu1 %v885_v8  ;;  %v890_v17 = vld [vmem:[#allocation8 + $0x30] sm:$0xff]   ;;  %v879_v18 = vld [vmem:[#allocation3 + $0x18] sm:$0xff]   ;;  %v880_v19 = vld [vmem:[#allocation3 + $0x20] sm:$0xff]  }
  0x3d   :  { %802 = vmatprep.subr.bf16.mxu0 %v870_v2  ;;  %v881_v20 = vld [vmem:[#allocation3 + $0x28] sm:$0xff]   ;;  %v882_v21 = vld [vmem:[#allocation3 + $0x30] sm:$0xff]   ;;  %v883_v22 = vld [vmem:[#allocation3 + $0x38] sm:$0xff]  }
  0x3e   :  { %v891_v23 = vld [vmem:[#allocation8 + $0x38] sm:$0xff]   ;;  %v678_v48 = vld [vmem:[%s1090_s3] ss:$0 sm:$0xff]  ;;  %s991_s3 = smov [#allocation9]  }
  0x3f   :  { %833 = vmatpush3.bf16.msra.mxu1 %v885_v8  ;;  %s649_s26 = sshll.u32 %s991_s3, 4  ;;  %s650_s26 = int_to_ptr.vmem [resolvable:$true] %s649_s26 }
  0x40   :  { %803 = vmatpush3.bf16.msra.mxu0 %v870_v2  ;;  %834 = vmatprep.subr.bf16.mxu1 %v886_v10  ;;  %s958_s29 = scalar_lea.vmem %s650_s26, 1024  ;;  %p963_p11 = scmp.lt.s32.totalorder %s650_s26, %s650_s26 }
  0x41   :  { %804 = vmatprep.subr.bf16.mxu0 %v871_v3  ;;  %p959_p10 = scmp.ne.s32.totalorder %s650_s26, %s958_s29  ;;  %p964_p12 = scmp.lt.s32.totalorder %s958_s29, %s958_s29 }
  0x43   :  { %835 = vmatpush3.bf16.msra.mxu1 %v886_v10  ;;  %p965_p13 = por %p964_p12, %p963_p11 }
  0x44   :  { %805 = vmatpush3.bf16.msra.mxu0 %v871_v3  ;;  %836 = vmatprep.subr.bf16.mxu1 %v887_v12 }
  0x45   :  { %806 = vmatprep.subr.bf16.mxu0 %v872_v5  ;;  %p966_p0 = pnand %p965_p13, %p959_p10 }
  0x47   :  { %837 = vmatpush3.bf16.msra.mxu1 %v887_v12 }
  0x48   :  { %807 = vmatpush3.bf16.msra.mxu0 %v872_v5  ;;  %838 = vmatprep.subr.bf16.mxu1 %v888_v13 }
  0x49   :  { %808 = vmatprep.subr.bf16.mxu0 %v873_v6 }
  0x4b   :  { %839 = vmatpush3.bf16.msra.mxu1 %v888_v13 }
  0x4c   :  { %809 = vmatpush3.bf16.msra.mxu0 %v873_v6  ;;  %840 = vmatprep.subr.bf16.mxu1 %v889_v16 }
  0x4d   :  { %810 = vmatprep.subr.bf16.mxu0 %v874_v9 }
  0x4f   :  { %841 = vmatpush3.bf16.msra.mxu1 %v889_v16 }
  0x50   :  { %811 = vmatpush3.bf16.msra.mxu0 %v874_v9  ;;  %842 = vmatprep.subr.bf16.mxu1 %v890_v17 }
  0x51   :  { %812 = vmatprep.subr.bf16.mxu0 %v875_v11 }
  0x53   :  { %843 = vmatpush3.bf16.msra.mxu1 %v890_v17 }
  0x54   :  { %813 = vmatpush3.bf16.msra.mxu0 %v875_v11  ;;  %844 = vmatprep.subr.bf16.mxu1 %v891_v23 }
  0x57   :  { %815 = vmatmul.mubr.bf16.vlgmr.msra.gmra.mrb[0].mxu0 %v877_v14  ;;  %845 = vmatpush3.bf16.msra.mxu1 %v891_v23 }
  0x58   :  { %818 = vmatprep.mubr.bf16.mxu0 %v878_v15 }
  0x5f   :  { %819 = vmatmul.mubr.bf16.gmra.mrb[4].mxu0 %v879_v18 }
  0x60   :  { %822 = vmatprep.mubr.bf16.mxu0 %v880_v19 }
  0x67   :  { %823 = vmatmul.mubr.bf16.gmra.mrb[8].mxu0 %v881_v20 }
  0x68   :  { %826 = vmatprep.mubr.bf16.mxu0 %v882_v21 }
  0x6f   :  { %827 = vmatmul.mubr.bf16.gmra.mrb[12].mxu0 %v883_v22 }
 0x12a   :  { %v816_v24 = vpop.f32.mrb[0].mxu0 }
 0x12b   :  { %v258_v25 = vpop.f32.mrb[1].mxu0 }
 0x12c   :  { %v817_v26 = vpop.f32.mrb[2].mxu0 }
 0x12d   :  { %v373_v27 = vpack.c.bf16 %v817_v26, %v816_v24  ;;  %v261_v28 = vpop.f32.mrb[3].mxu0 }
 0x12e   :  { %v372_v29 = vpack.c.bf16 %v261_v28, %v258_v25 }
 0x130   :  { %846 = vmatprep.mubr.bf16.mxu1 %v372_v29 }
 0x131   :  { %847 = vmatmul.mubr.bf16.vlgmr.msra.gmra.mrb[0].mxu1 %v373_v27 }
 0x132   :  { %v820_v30 = vpop.f32.mrb[4].mxu0 }
 0x133   :  { %v274_v31 = vpop.f32.mrb[5].mxu0 }
 0x134   :  { %v821_v32 = vpop.f32.mrb[6].mxu0 }
 0x135   :  { %v375_v33 = vpack.c.bf16 %v821_v32, %v820_v30  ;;  %v277_v34 = vpop.f32.mrb[7].mxu0 }
 0x136   :  { %v374_v35 = vpack.c.bf16 %v277_v34, %v274_v31 }
 0x138   :  { %850 = vmatprep.mubr.bf16.mxu1 %v374_v35 }
 0x139   :  { %851 = vmatmul.mubr.bf16.gmra.mrb[4].mxu1 %v375_v33 }
 0x13a   :  { %v824_v36 = vpop.f32.mrb[8].mxu0 }
 0x13b   :  { %v290_v37 = vpop.f32.mrb[9].mxu0 }
 0x13c   :  { %v825_v38 = vpop.f32.mrb[10].mxu0 }
 0x13d   :  { %v377_v39 = vpack.c.bf16 %v825_v38, %v824_v36  ;;  %v293_v40 = vpop.f32.mrb[11].mxu0 }
 0x13e   :  { %v376_v41 = vpack.c.bf16 %v293_v40, %v290_v37 }
 0x140   :  { %854 = vmatprep.mubr.bf16.mxu1 %v376_v41 }
 0x141   :  { %855 = vmatmul.mubr.bf16.gmra.mrb[8].mxu1 %v377_v39 }
 0x142   :  { %v828_v42 = vpop.f32.mrb[12].mxu0 }
 0x143   :  { %v306_v43 = vpop.f32.mrb[13].mxu0 }
 0x144   :  { %v829_v44 = vpop.f32.mrb[14].mxu0 }
 0x145   :  { %v379_v45 = vpack.c.bf16 %v829_v44, %v828_v42  ;;  %v309_v46 = vpop.f32.mrb[15].mxu0 }
 0x146   :  { %v378_v47 = vpack.c.bf16 %v309_v46, %v306_v43 }
 0x148   :  { %858 = vmatprep.mubr.bf16.mxu1 %v378_v47 }
 0x149   :  { %859 = vmatmul.mubr.bf16.gmra.mrb[12].mxu1 %v379_v45 }
 0x204   :  { %v848_v49 = vpop.f32.mrb[0].mxu1 }
 0x205   :  { %v494_v50 = vadd.f32 %v848_v49, %v678_v48  ;;  %v485_v51 = vpop.f32.mrb[1].mxu1 }
 0x206   :  { %v486_v52 = vadd.f32 %v678_v48, %v485_v51  ;;  %v849_v53 = vpop.f32.mrb[2].mxu1 }
 0x207   :  { %v497_v54 = vadd.f32 %v849_v53, %v678_v48  ;;  %v488_v55 = vpop.f32.mrb[3].mxu1  ;;  %v550_v57 = vmax.f32 %v494_v50, 0.0 }
 0x208   :  { %v489_v56 = vadd.f32 %v678_v48, %v488_v55  ;;  %v548_v59 = vmax.f32 %v486_v52, 0.0 }
 0x209   :  { %v551_v58 = vmax.f32 %v497_v54, 0.0 }
 0x20a   :  { %v549_v60 = vmax.f32 %v489_v56, 0.0 }
 0x20b   :  { %v727_v61 = vpack.c.bf16 %v551_v58, %v550_v57 }
 0x20c   :  { %v722_v62 = vpack.c.bf16 %v549_v60, %v548_v59  ;;  %v852_v63 = vpop.f32.mrb[4].mxu1 }
 0x20d   :  { %759 = vst [vmem:[#allocation9 + $0x8] sm:$0xff] %v727_v61   ;;  %v510_v0 = vadd.f32 %v852_v63, %v678_v48  ;;  %v501_v1 = vpop.f32.mrb[5].mxu1 }
 0x20e   :  { %723 = vst [vmem:[#allocation9] sm:$0xff] %v722_v62   ;;  %v502_v2 = vadd.f32 %v678_v48, %v501_v1  ;;  %v853_v3 = vpop.f32.mrb[6].mxu1 }
 0x20f   :  { %v513_v4 = vadd.f32 %v853_v3, %v678_v48  ;;  %v504_v5 = vpop.f32.mrb[7].mxu1  ;;  %v554_v7 = vmax.f32 %v510_v0, 0.0 }
 0x210   :  { %v505_v6 = vadd.f32 %v678_v48, %v504_v5  ;;  %v552_v9 = vmax.f32 %v502_v2, 0.0 }
 0x211   :  { %v555_v8 = vmax.f32 %v513_v4, 0.0 }
 0x212   :  { %v553_v10 = vmax.f32 %v505_v6, 0.0 }
 0x213   :  { %v737_v11 = vpack.c.bf16 %v555_v8, %v554_v7 }
 0x214   :  { %v732_v12 = vpack.c.bf16 %v553_v10, %v552_v9  ;;  %v856_v13 = vpop.f32.mrb[8].mxu1 }
 0x215   :  { %761 = vst [vmem:[#allocation9 + $0x18] sm:$0xff] %v737_v11   ;;  %v526_v14 = vadd.f32 %v856_v13, %v678_v48  ;;  %v517_v15 = vpop.f32.mrb[9].mxu1 }
 0x216   :  { %760 = vst [vmem:[#allocation9 + $0x10] sm:$0xff] %v732_v12   ;;  %v518_v16 = vadd.f32 %v678_v48, %v517_v15  ;;  %v857_v17 = vpop.f32.mrb[10].mxu1 }
 0x217   :  { %v529_v18 = vadd.f32 %v857_v17, %v678_v48  ;;  %v520_v19 = vpop.f32.mrb[11].mxu1  ;;  %v558_v21 = vmax.f32 %v526_v14, 0.0 }
 0x218   :  { %v521_v20 = vadd.f32 %v678_v48, %v520_v19  ;;  %v556_v23 = vmax.f32 %v518_v16, 0.0 }
 0x219   :  { %v559_v22 = vmax.f32 %v529_v18, 0.0 }
 0x21a   :  { %v557_v24 = vmax.f32 %v521_v20, 0.0 }
 0x21b   :  { %v747_v25 = vpack.c.bf16 %v559_v22, %v558_v21 }
 0x21c   :  { %v742_v26 = vpack.c.bf16 %v557_v24, %v556_v23  ;;  %v860_v27 = vpop.f32.mrb[12].mxu1 }
 0x21d   :  { %763 = vst [vmem:[#allocation9 + $0x28] sm:$0xff] %v747_v25   ;;  %v542_v28 = vadd.f32 %v860_v27, %v678_v48  ;;  %v533_v29 = vpop.f32.mrb[13].mxu1 }
 0x21e   :  { %762 = vst [vmem:[#allocation9 + $0x20] sm:$0xff] %v742_v26   ;;  %v534_v30 = vadd.f32 %v678_v48, %v533_v29  ;;  %v861_v31 = vpop.f32.mrb[14].mxu1 }
 0x21f   :  { %v545_v32 = vadd.f32 %v861_v31, %v678_v48  ;;  %v536_v33 = vpop.f32.mrb[15].mxu1  ;;  %v562_v35 = vmax.f32 %v542_v28, 0.0 }
 0x220   :  { %v537_v34 = vadd.f32 %v678_v48, %v536_v33  ;;  %v560_v37 = vmax.f32 %v534_v30, 0.0 }
 0x221   :  { %v563_v36 = vmax.f32 %v545_v32, 0.0 }
 0x222   :  { %v561_v38 = vmax.f32 %v537_v34, 0.0 }
 0x223   :  { %v757_v39 = vpack.c.bf16 %v563_v36, %v562_v35 }
 0x224   :  { %v752_v40 = vpack.c.bf16 %v561_v38, %v560_v37 }
 0x225   :  { %765 = vst [vmem:[#allocation9 + $0x38] sm:$0xff] %v757_v39  }
 0x226   :  { %764 = vst [vmem:[#allocation9 + $0x30] sm:$0xff] %v752_v40  }
 0x227   :  { %969 = shalt.err (!%p966_p0)
}
 0x228   :  { %s970_s6 = scalar_lea.hbm %s1091_s4, 1024 }
 0x229   :  { %p971_p1 = scmp.ne.s32.totalorder %s1091_s4, %s970_s6  ;;  %p974_p2 = scmp.lt.u32.totalorder %s970_s6, %s1091_s4 }
 0x22b   :  { %p976_p3 = pnand %p974_p2, %p971_p1 }
 0x22d   :  { %979 = shalt.err (!%p976_p3)
}
 0x22e   :  { %655 = dma.vmem_to_hbm [thread:$0]  %s650_s26, 1024, %s1091_s4, [#allocation5], %s988_s27, %s988_s27, %s989_s28  }
 0x22f   :  { %984 = dma.done.wait [#allocation5], 1024  }
 0x230   :  { %985 = vsyncadd [#allocation5], 4294966272 }
 0x231   :  { %659 = vsyncpa [#allocation4], 1 }
 0x232   :  { %660 = vsyncpa [#allocation7], 1 }
 0x233   :  { %661 = vsyncpa [#allocation5], 1 }

</bundles_post_ra>
